<compile_context>
chip_gen: v6e
topology: v6e:2x2x1
jax: 0.10.0
libtpu: 0.0.40
codegen_flags: <defaults>
</compile_context>

<pallas_src>
import functools

import jax
import jax.numpy as jnp
from jax.experimental import pallas as pl
from jax.experimental.pallas import tpu as pltpu


def _round_up(x, m):
    return (x + m - 1) // m * m


def _convtr1d_kernel(x_ref, w_ref, b_ref, o_ref, carry_ref, *acc_scratch,
                     TL, G, D, Wp, H, fuse_acc):
    """One (batch-tile, L-tile) step.

    x_ref:     (TN, TL, C_in)            input tile (channels-last)
    w_ref:     (C_in, G*Wp)              fused weight, all K taps side by side
    b_ref:     (1, Wp)                   phase-interleaved bias (zero-padded lanes)
    o_ref:     (TN, TL, Wp)              output tile (phase-compressed rows)
    carry_ref: (TN, max(H,1), Wp) f32    halo carried into the next L tile
    acc_scratch: optional (TN, TL, Wp) f32 accumulator (only when o_ref is not f32)
    """
    l = pl.program_id(1)

    @pl.when(l == 0)
    def _init_carry():
        carry_ref[...] = jnp.zeros_like(carry_ref)

    # One wide MXU matmul covering all K taps (native-dtype operands, f32 accumulate).
    part = jax.lax.dot_general(
        x_ref[...], w_ref[...], (((2,), (0,)), ((), ())),
        preferred_element_type=jnp.float32)              # (TN, TL, G*Wp)

    bias = b_ref[...][None].astype(jnp.float32)          # (1, 1, Wp)

    acc = o_ref if fuse_acc else acc_scratch[0]

    if H > 0:
        carry_prev = carry_ref[...]                      # halo from previous L tile
        carry_ref[...] = jnp.zeros_like(carry_ref)       # becomes the new halo acc

    # Tap group 0: direct store over the whole tile (no read-modify-write).
    if fuse_acc:
        acc[...] = part[:, :, :Wp] + bias                # bias folded in exactly once
    else:
        acc[...] = part[:, :, :Wp]

    # Tap groups 1..G-1: slice-accumulate; rows spilling past the tile go to carry.
    for g in range(1, G):
        off = g * D
        seg = part[:, :, g * Wp:(g + 1) * Wp]
        if off < TL:
            acc[:, off:, :] += seg[:, :TL - off, :]
        carry_ref[:, :off, :] += seg[:, TL - off:, :]

    if H > 0:
        acc[:, :H, :] += carry_prev                      # fold in carried halo

    if not fuse_acc:
        o_ref[...] = (acc[...] + bias).astype(o_ref.dtype)


def norm_conv_transpose1d(x, weight, bias=None, *, stride=1, dilation=1):
    """Forward of NormConvTranspose1d (norm='none').

    x: (N, C_in, L_in); weight: (C_in, C_out, K) [torch ConvTranspose1d layout];
    bias: (C_out,) or None.  Returns (N, C_out, L_out) with
    L_out = (L_in - 1) * stride + dilation * (K - 1) + 1.
    """
    assert stride == 1 or dilation == 1, "stride and dilation cannot both be > 1"
    N, C_in, L_in = x.shape
    assert weight.shape[0] == C_in
    _, C_out, K = weight.shape
    S, D = int(stride), int(dilation)
    L_out = (L_in - 1) * S + D * (K - 1) + 1

    G = -(-K // S)                      # offset groups = ceil(K / stride)
    H = (G - 1) * D                     # halo rows spilling into the next output tile
    W = S * C_out                       # phase-interleaved lane width (real)
    Wp = _round_up(W, 128)              # lane-dense width (unmasked vst, aligned slices)
    Df = G * Wp                         # fused matmul output width

    TN = 1
    fuse_acc = (x.dtype == jnp.float32)  # accumulate straight into the resident o block

    x_item = jnp.dtype(x.dtype).itemsize
    w_item = jnp.dtype(weight.dtype).itemsize
    o_item = x_item

    def vmem_need(tl):
        return (TN * tl * Df * 4                          # matmul result temp
                + 2 * TN * tl * C_in * x_item             # x (double-buffered)
                + 2 * C_in * Df * w_item                  # fused weight buffers
                + 2 * TN * tl * Wp * o_item               # output block (double-buffered)
                + (0 if fuse_acc else TN * tl * Wp * 4)   # f32 accumulator (bf16 path)
                + TN * max(H, 1) * Wp * 4                 # halo carry
                + (2 << 20))                              # compiler slack

    # Per-generation VMEM budget (128 MiB v5e/v6e, 64 MiB v7x), with headroom.
    try:
        vmem_cap = int(pltpu.get_tpu_info().vmem_capacity_bytes)
    except Exception:
        vmem_cap = 64 << 20
    budget = max(24 << 20, (vmem_cap * 3) // 4)

    # L tile: biggest that fits the budget (VMEM bounded independent of L thanks to
    # M-tiling + carried halo); must be >= H so a single carry covers the halo.
    TL_min = max(8, _round_up(H, 8))
    TL_pref = 2048 if budget >= (80 << 20) else 1024
    TL = max(TL_min, min(TL_pref, _round_up(L_in, 8)))
    while TL > TL_min and vmem_need(TL) > budget:
        TL = max(TL_min, _round_up(TL // 2, 8))

    nl = -(-L_in // TL)
    NF = nl + (1 if H > 0 else 0)       # one extra step flushes the final halo
    L_pad = NF * TL

    # channels-last input, zero-padded so every tile is full (zero rows contribute 0).
    # TODO(synk): for channels-last callers the wrapper in/out transposes are extra
    # HBM passes; an NLC entry point would drop them.
    x_nlc = jnp.transpose(x, (0, 2, 1))                   # (N, L, C_in)
    if L_pad != L_in:
        x_nlc = jnp.pad(x_nlc, ((0, 0), (0, L_pad - L_in), (0, 0)))

    # Fused weight: column g*Wp + p*C_out + co <- weight[ci, co, k=g*S+p]; taps padded
    # to G*S and lanes padded to Wp (zero columns are free on the underutilized MXU).
    w_k = jnp.transpose(weight, (2, 0, 1))                # (K, C_in, C_out)
    if G * S != K:
        w_k = jnp.concatenate(
            [w_k, jnp.zeros((G * S - K, C_in, C_out), w_k.dtype)], axis=0)
    w_g = w_k.reshape(G, S, C_in, C_out).transpose(2, 0, 1, 3).reshape(C_in, G, W)
    if Wp != W:
        w_g = jnp.pad(w_g, ((0, 0), (0, 0), (0, Wp - W)))
    w_fused = w_g.reshape(C_in, Df)

    b = bias if bias is not None else jnp.zeros((C_out,), x.dtype)
    b_fused = jnp.tile(b, (S,))                           # same bias for every phase
    if Wp != W:
        b_fused = jnp.pad(b_fused, ((0, Wp - W),))
    b_fused = b_fused.reshape(1, Wp)

    est = vmem_need(TL)
    vmem_limit = int(min(max(est + (4 << 20), 32 << 20),
                         max(vmem_cap - (4 << 20), 32 << 20)))

    kernel = functools.partial(_convtr1d_kernel, TL=TL, G=G, D=D, Wp=Wp, H=H,
                               fuse_acc=fuse_acc)
    scratch = [pltpu.VMEM((TN, max(H, 1), Wp), jnp.float32)]
    if not fuse_acc:
        scratch.append(pltpu.VMEM((TN, TL, Wp), jnp.float32))

    out = pl.pallas_call(
        kernel,
        out_shape=jax.ShapeDtypeStruct((N, L_pad, Wp), x.dtype),
        grid_spec=pltpu.PrefetchScalarGridSpec(
            num_scalar_prefetch=0,
            grid=(N // TN, NF),
            in_specs=[
                pl.BlockSpec((TN, TL, C_in), lambda i, l: (i, l, 0)),
                pl.BlockSpec((C_in, Df), lambda i, l: (0, 0)),
                pl.BlockSpec((1, Wp), lambda i, l: (0, 0)),
            ],
            out_specs=pl.BlockSpec((TN, TL, Wp), lambda i, l: (i, l, 0)),
            scratch_shapes=scratch,
        ),
        compiler_params=pltpu.CompilerParams(
            # TODO(synk): on v7x with N == 1 both TensorCores could be fed by also
            # splitting the (carry-coupled) L axis per core; batch-parallel for now.
            dimension_semantics=("parallel", "arbitrary"),
            vmem_limit_bytes=vmem_limit,
        ),
        cost_estimate=pl.CostEstimate(
            flops=2 * N * L_pad * C_in * Df,
            transcendentals=0,
            bytes_accessed=int(x_nlc.size * x_item + w_fused.size * w_item
                               + N * L_pad * Wp * o_item),
        ),
    )(x_nlc, w_fused, b_fused)

    # (N, L_pad, Wp): drop padded lanes, de-interleave phases (t = m*S + p), trim, NCL.
    y = out[:, :, :W].reshape(N, L_pad * S, C_out)[:, :L_out, :]
    return jnp.transpose(y, (0, 2, 1))


def _ref_conv_transpose1d(x, weight, bias, *, stride=1, dilation=1):
    """Pure-JAX reference matching torch.nn.ConvTranspose1d (padding=0, output_padding=0)."""
    N, C_in, L_in = x.shape
    _, C_out, K = weight.shape
    L_out = (L_in - 1) * stride + dilation * (K - 1) + 1
    y = jnp.zeros((N, C_out, L_out), jnp.float32) + bias[None, :, None]
    for k in range(K):
        part = jnp.einsum('ncl,cd->ndl', x, weight[:, :, k])        # (N, C_out, L_in)
        y = y.at[:, :, k * dilation: k * dilation + (L_in - 1) * stride + 1: stride].add(part)
    return y


if __name__ == "__main__":
    key = jax.random.PRNGKey(0)
    kx, kw1, kb1, kw2, kb2 = jax.random.split(key, 5)

    # NormConvTranspose1d(in_channels=4, out_channels=8, ...) on x of shape (N=2, C_in=4, L_in=16)
    N, C_in, C_out, L_in = 2, 4, 8, 16
    x = jax.random.normal(kx, (N, C_in, L_in), dtype=jnp.float32)

    ok = True
    configs = [
        dict(kernel_size=3, stride=2, dilation=1),   # strided transposed conv
        dict(kernel_size=5, stride=1, dilation=2),   # dilated transposed conv
    ]
    for cfg, kw, kb in zip(configs, (kw1, kw2), (kb1, kb2)):
        K = cfg["kernel_size"]
        # ConvTranspose1d weight shape: (in_channels, out_channels, kernel_size)
        weight = 0.1 * jax.random.normal(kw, (C_in, C_out, K), dtype=jnp.float32)
        b = 0.1 * jax.random.normal(kb, (C_out,), dtype=jnp.float32)

        y = norm_conv_transpose1d(x, weight, b,
                                  stride=cfg["stride"], dilation=cfg["dilation"])
        y = jax.block_until_ready(y)
        y_ref = _ref_conv_transpose1d(x, weight, b,
                                      stride=cfg["stride"], dilation=cfg["dilation"])
        if y.shape != y_ref.shape or not bool(jnp.allclose(y, y_ref, atol=1e-4, rtol=1e-4)):
            ok = False

    if ok:
        print("KERNEL_OK")
</pallas_src>

<mosaic_0001>
module attributes {stable_mosaic.version = 11 : i64} {
  func.func @_convtr1d_kernel(%arg0: i32, %arg1: i32, %arg2: memref<1x16x4xf32, #tpu.memory_space<vmem>>, %arg3: memref<4x256xf32, #tpu.memory_space<vmem>>, %arg4: memref<1x128xf32, #tpu.memory_space<vmem>>, %arg5: memref<1x16x128xf32, #tpu.memory_space<vmem>>, %arg6: memref<1x1x128xf32, #tpu.memory_space<vmem>>) attributes {dimension_semantics = [#tpu.dimension_semantics<parallel>, #tpu.dimension_semantics<arbitrary>], iteration_bounds = array<i64: 2, 2>, scalar_prefetch = 0 : i64, scratch_operands = 1 : i64, tpu.core_type = #tpu.core_type<tc>, window_params = [{transform_indices = @transform_0, window_bounds = array<i64: 1, 16, 4>}, {pipeline_mode = #tpu.pipeline_mode<synchronous>, transform_indices = @transform_1, window_bounds = array<i64: 4, 256>}, {pipeline_mode = #tpu.pipeline_mode<synchronous>, transform_indices = @transform_2, window_bounds = array<i64: 1, 128>}, {transform_indices = @transform_3, window_bounds = array<i64: 1, 16, 128>}]} {
    %c0_i32 = arith.constant 0 : i32
    %0 = arith.cmpi eq, %arg1, %c0_i32 : i32
    %1 = arith.extui %0 : i1 to i32
    %c0_i32_0 = arith.constant 0 : i32
    %2 = arith.cmpi ne, %1, %c0_i32_0 : i32
    scf.if %2 {
      %cst_34 = arith.constant 0.000000e+00 : f32
      %27 = vector.broadcast %cst_34 : f32 to vector<1x1x128xf32>
      %c0_35 = arith.constant 0 : index
      %c0_36 = arith.constant 0 : index
      %c0_37 = arith.constant 0 : index
      %28 = vector.load %arg6[%c0_35, %c0_36, %c0_37] : memref<1x1x128xf32, #tpu.memory_space<vmem>>, vector<1x1x128xf32>
      tpu.vector_store %arg6[%c0_35, %c0_36, %c0_37], %27 {strides = array<i32>} : memref<1x1x128xf32, #tpu.memory_space<vmem>>, vector<1x1x128xf32>,
    } else {
    }
    %c0 = arith.constant 0 : index
    %c0_1 = arith.constant 0 : index
    %c0_2 = arith.constant 0 : index
    %3 = vector.load %arg2[%c0, %c0_1, %c0_2] : memref<1x16x4xf32, #tpu.memory_space<vmem>>, vector<1x16x4xf32>
    %c0_3 = arith.constant 0 : index
    %c0_4 = arith.constant 0 : index
    %4 = vector.load %arg3[%c0_3, %c0_4] : memref<4x256xf32, #tpu.memory_space<vmem>>, vector<4x256xf32>
    %cst = arith.constant dense<0.000000e+00> : vector<1x16x256xf32>
    %5 = tpu.matmul %3, %4, %cst {dimension_numbers = #tpu.dot_dimension_numbers<[2], [0], [0, 1], [1], [0, 0, 0, 1, 1, 1], [], []>} : vector<1x16x4xf32>, vector<4x256xf32>, vector<1x16x256xf32> -> vector<1x16x256xf32>
    %c0_5 = arith.constant 0 : index
    %c0_6 = arith.constant 0 : index
    %6 = vector.load %arg4[%c0_5, %c0_6] : memref<1x128xf32, #tpu.memory_space<vmem>>, vector<1x128xf32>
    %7 = vector.shape_cast %6 : vector<1x128xf32> to vector<1x1x128xf32>
    %c0_7 = arith.constant 0 : index
    %c0_8 = arith.constant 0 : index
    %c0_9 = arith.constant 0 : index
    %8 = vector.load %arg6[%c0_7, %c0_8, %c0_9] : memref<1x1x128xf32, #tpu.memory_space<vmem>>, vector<1x1x128xf32>
    %cst_10 = arith.constant 0.000000e+00 : f32
    %9 = vector.broadcast %cst_10 : f32 to vector<1x1x128xf32>
    %c0_11 = arith.constant 0 : index
    %c0_12 = arith.constant 0 : index
    %c0_13 = arith.constant 0 : index
    %10 = vector.load %arg6[%c0_11, %c0_12, %c0_13] : memref<1x1x128xf32, #tpu.memory_space<vmem>>, vector<1x1x128xf32>
    tpu.vector_store %arg6[%c0_11, %c0_12, %c0_13], %9 {strides = array<i32>} : memref<1x1x128xf32, #tpu.memory_space<vmem>>, vector<1x1x128xf32>,
    %11 = vector.extract_strided_slice %5 {offsets = [0, 0, 0], sizes = [1, 16, 128], strides = [1, 1, 1]} : vector<1x16x256xf32> to vector<1x16x128xf32>
    %12 = vector.broadcast %7 : vector<1x1x128xf32> to vector<1x16x128xf32>
    %13 = arith.addf %11, %12 : vector<1x16x128xf32>
    %c0_14 = arith.constant 0 : index
    %c0_15 = arith.constant 0 : index
    %c0_16 = arith.constant 0 : index
    %14 = vector.load %arg5[%c0_14, %c0_15, %c0_16] : memref<1x16x128xf32, #tpu.memory_space<vmem>>, vector<1x16x128xf32>
    tpu.vector_store %arg5[%c0_14, %c0_15, %c0_16], %13 {strides = array<i32>} : memref<1x16x128xf32, #tpu.memory_space<vmem>>, vector<1x16x128xf32>,
    %15 = vector.extract_strided_slice %5 {offsets = [0, 0, 128], sizes = [1, 16, 128], strides = [1, 1, 1]} : vector<1x16x256xf32> to vector<1x16x128xf32>
    %c0_17 = arith.constant 0 : index
    %c1 = arith.constant 1 : index
    %c0_18 = arith.constant 0 : index
    %16 = vector.load %arg5[%c0_17, %c1, %c0_18] : memref<1x16x128xf32, #tpu.memory_space<vmem>>, vector<1x15x128xf32>
    %17 = vector.extract_strided_slice %15 {offsets = [0, 0, 0], sizes = [1, 15, 128], strides = [1, 1, 1]} : vector<1x16x128xf32> to vector<1x15x128xf32>
    %18 = arith.addf %16, %17 : vector<1x15x128xf32>
    %c0_19 = arith.constant 0 : index
    %c1_20 = arith.constant 1 : index
    %c0_21 = arith.constant 0 : index
    %19 = vector.load %arg5[%c0_19, %c1_20, %c0_21] : memref<1x16x128xf32, #tpu.memory_space<vmem>>, vector<1x15x128xf32>
    tpu.vector_store %arg5[%c0_19, %c1_20, %c0_21], %18 {strides = array<i32>} : memref<1x16x128xf32, #tpu.memory_space<vmem>>, vector<1x15x128xf32>,
    %c0_22 = arith.constant 0 : index
    %c0_23 = arith.constant 0 : index
    %c0_24 = arith.constant 0 : index
    %20 = vector.load %arg6[%c0_22, %c0_23, %c0_24] : memref<1x1x128xf32, #tpu.memory_space<vmem>>, vector<1x1x128xf32>
    %21 = vector.extract_strided_slice %15 {offsets = [0, 15, 0], sizes = [1, 1, 128], strides = [1, 1, 1]} : vector<1x16x128xf32> to vector<1x1x128xf32>
    %22 = arith.addf %20, %21 : vector<1x1x128xf32>
    %c0_25 = arith.constant 0 : index
    %c0_26 = arith.constant 0 : index
    %c0_27 = arith.constant 0 : index
    %23 = vector.load %arg6[%c0_25, %c0_26, %c0_27] : memref<1x1x128xf32, #tpu.memory_space<vmem>>, vector<1x1x128xf32>
    tpu.vector_store %arg6[%c0_25, %c0_26, %c0_27], %22 {strides = array<i32>} : memref<1x1x128xf32, #tpu.memory_space<vmem>>, vector<1x1x128xf32>,
    %c0_28 = arith.constant 0 : index
    %c0_29 = arith.constant 0 : index
    %c0_30 = arith.constant 0 : index
    %24 = vector.load %arg5[%c0_28, %c0_29, %c0_30] : memref<1x16x128xf32, #tpu.memory_space<vmem>>, vector<1x1x128xf32>
    %25 = arith.addf %24, %8 : vector<1x1x128xf32>
    %c0_31 = arith.constant 0 : index
    %c0_32 = arith.constant 0 : index
    %c0_33 = arith.constant 0 : index
    %26 = vector.load %arg5[%c0_31, %c0_32, %c0_33] : memref<1x16x128xf32, #tpu.memory_space<vmem>>, vector<1x1x128xf32>
    tpu.vector_store %arg5[%c0_31, %c0_32, %c0_33], %25 {strides = array<i32>} : memref<1x16x128xf32, #tpu.memory_space<vmem>>, vector<1x1x128xf32>,
    return
  }
  func.func @transform_0(%arg0: i32, %arg1: i32) -> (i32, i32, i32) {
    %c0_i32 = arith.constant 0 : i32
    %c0_i32_0 = arith.constant 0 : i32
    return %arg0, %arg1, %c0_i32 : i32, i32, i32
  }
  func.func @transform_1(%arg0: i32, %arg1: i32) -> (i32, i32) {
    %c0_i32 = arith.constant 0 : i32
    %c0_i32_0 = arith.constant 0 : i32
    %c0_i32_1 = arith.constant 0 : i32
    return %c0_i32, %c0_i32_0 : i32, i32
  }
  func.func @transform_2(%arg0: i32, %arg1: i32) -> (i32, i32) {
    %c0_i32 = arith.constant 0 : i32
    %c0_i32_0 = arith.constant 0 : i32
    %c0_i32_1 = arith.constant 0 : i32
    return %c0_i32, %c0_i32_0 : i32, i32
  }
  func.func @transform_3(%arg0: i32, %arg1: i32) -> (i32, i32, i32) {
    %c0_i32 = arith.constant 0 : i32
    %c0_i32_0 = arith.constant 0 : i32
    return %arg0, %arg1, %c0_i32 : i32, i32, i32
  }
}

</mosaic_0001>

<bundles_post_ra>
// kernel: tpu_custom_call.1
= control target key start
LH: loop header
LB: loop body
LE: loop exit
PB: predicated region body
PF: predicated region fallthrough
CT: control target
= control target key end

     0   :  { %8 = vsyncpa [#allocation4], 0  ;;  %s825_s0 = inlined_call_operand.vmem [shape: f32[2,32,4], index: 0, kind: input, shape index: {}]   ;;  %s826_s1 = inlined_call_operand.vmem [shape: f32[4,256], index: 1, kind: input, shape index: {}]   ;;  %s827_s2 = inlined_call_operand.vmem [shape: f32[1,128], index: 2, kind: input, shape index: {}]   ;;  %s828_s3 = inlined_call_operand.hbm [shape: f32[2,32,128], index: 3, kind: output, shape index: {}]  }
   0x1   :  { %10 = vsyncpa [#allocation4 + $0x1], 0  ;;  %s661_s12 = smov 0   ;;  %s663_s13 = smov 0  }
   0x2   :  { %s665_s14 = smov 0   ;;  %s667_s15 = smov 0  }
   0x3   :  { %s669_s16 = smov 0   ;;  %s671_s17 = smov 0  }
   0x4   :  { %s673_s18 = smov 0   ;;  %s675_s19 = smov 0  }
   0x5 LB: > { %s441_s20 = sadd.s32 4294967295, %s633_s19   ;;  %s442_s21 = sadd.s32 4294967294, %s633_s19   ;;  %s633_s19 = sphi %s675_s19, %s16_s19   ;;  %s629_s18 = sphi %s673_s18, %s837_s18   ;;  %s625_s17 = sphi %s671_s17, %s836_s17   ;;  %s621_s16 = sphi %s669_s16, %s835_s16   ;;  %s617_s15 = sphi %s667_s15, %s834_s15   ;;  %s613_s14 = sphi %s665_s14, %s833_s14   ;;  %s609_s13 = sphi %s663_s13, %s832_s13   ;;  %s605_s12 = sphi %s661_s12, %s831_s12  }
   0x6   : > { %s25_s22 = sadd.s32 1, %s625_s17  ;;  %s28_s23 = sadd.s32 1, %s629_s18 }
   0x7   : > { %p26_p0 = scmp.ge.s32.totalorder %s25_s22, 2  ;;  %p117_p1 = scmp.ne.s32.totalorder %s613_s14, %s609_s13 }
   0x8   : > { %p118_p2 = scmp.eq.s32.totalorder %s441_s20, 3  ;;  %p123_p5 = scmp.ne.s32.totalorder %s609_s13, %s605_s12 }
   0x9   : > { %s839_s22 = smov (%p26_p0, %s25_s22), 0  ;;  %s841_s23 = smov (!%p26_p0, %s28_s23), %s629_s18 }
   0xa   : > { %s103_s24 = ssub.s32 %s625_s17, %s839_s22  ;;  %p712_p3 = por %p118_p2, %p117_p1 }
   0xb   : > { %p30_p4 = scmp.ge.s32.totalorder %s841_s23, 2  ;;  %p124_p6 = scmp.eq.s32.totalorder %s442_s21, 3 }
   0xc   : > { %p445_p7 = scmp.ge.s32.totalorder %s633_s19, 1  ;;  %p161_p9 = scmp.lt.s32.totalorder %s633_s19, 5 }
   0xd   : > { %s843_s23 = smov (%p30_p4, %s841_s23), 0  ;;  %p721_p8 = por %p124_p6, %p123_p5 }
   0xe   : > { %s102_s27 = ssub.s32 %s629_s18, %s843_s23  ;;  %s107_s28 = sadd.s32 1, %s613_s14 }
   0xf   : > { %s104_s29 = sor.u32 %s103_s24, %s102_s27  ;;  %p162_p10 = pnand %p445_p7, %p161_p9 }
  0x10   : > { %p105_p11 = scmp.eq.s32.totalorder %s104_s29, 0  ;;  %s186_s4 = sand.u32 (!%p162_p10), 1, %s609_s13  }
  0x11   : > { %165 = sbr.rel (%p162_p10) target bundleno = 256 (0x100), region = 32  ;;  %s734_s5 = sshll.u32 (!%p162_p10), %s617_s15, 1 }
  0x12   : > { %s730_s30 = scalar_select %p105_p11, %s613_s14, %s107_s28  }
  0x13   : > { %s446_s6 = sshll.u32 (!%p162_p10), %s186_s4, 4  ;;  %p190_p12 = scmp.lt.s32.totalorder (!%p162_p10), %s621_s16, 1 }
  0x14   : > { %p192_p13 = scmp.lt.s32.totalorder (!%p162_p10), %s734_s5, 3  ;;  %s745_s27 = scalar_lea.vmem (!%p162_p10), [#allocation3], %s446_s6 }
  0x15   : > { %p450_p0 = scmp.ne.s32.totalorder (!%p162_p10), %s617_s15, 0 }
  0x16   : > { %s191_s7 = scalar_select %p190_p12, %s621_s16, 1 }
  0x17   : > { %s193_s8 = scalar_select %p192_p13, %s734_s5, 3 }
  0x18   : > { %s448_s9 = sshll.u32 %s191_s7, 2  ;;  %203 = sbr.rel (%p450_p0) target bundleno = 31 (0x1f), region = 36 }
  0x19   : > { %s195_s10 = sadd.s32 %s448_s9, %s193_s8 }
  0x1a   : > { %s449_s11 = sshll.u32 %s195_s10, 3 }
  0x1b   : > { %s197_s24 = scalar_lea.vmem %s825_s0, %s449_s11 }
  0x1d   : > { %v635_v0 = vmov 0.0  }
  0x1e   : > { %204 = vst [vmem:[#allocation2] sm:$0x1] %v635_v0 }
  0x1f PF: > { %v207_v1 = vld [vmem:[%s826_s1] sm:$0xff]  ;;  %vm217_vm0 = vcmask 1043456   ;;  %v636_v4 = vmov 0.0   ;;  %vm210_vm1 = vcmask 31744   ;;  %v206_v6 = vld [vmem:[%s197_s24 + $0x8] sm:$0xff]  ;;  %v324_v9 = vlaneseq  ;;  %s458_s7 = sshll.u32 %s621_s16, 2 }
  0x20   : > { %v209_v3 = vcombine.high %v207_v1, %v207_v1  ;;  %286 = vmatprep.mubr.f32.mxu0 %v636_v4  ;;  %292 = vmatprep.mubr.f32.mxu1 %v636_v4  ;;  %v205_v5 = vld [vmem:[%s197_s24] sm:$0xff]  ;;  %v637_v7 = vmov 1966171168   ;;  %s356_s8 = sadd.s32 %s458_s7, %s734_s5  ;;  %s359_s10 = sshll.u32 %s745_s27, 4  ;;  %s767_s10 = int_to_ptr.vmem [resolvable:$true] %s359_s10 }
  0x21   : > { %v322_v8 = vunpack.c.l.s4 %v637_v7  ;;  %v325_v11 = vshrl.u32 %v324_v9, 7  ;;  %v455_v12 = vld [vmem:[%s827_s2] ss:$0 sm:$0xff]  ;;  %s459_s9 = sshll.u32 %s356_s8, 7  ;;  %s774_s5 = scalar_lea.sflag [#allocation4], %s186_s4 }
  0x22   : > { %451 = vmatprep.subr.msk.mxu0 %vm217_vm0, %v209_v3  ;;  %462 = vmatprep.subr.msk.mxu1 %vm217_vm0, %v209_v3  ;;  %s765_s20 = scalar_lea.hbm %s828_s3, %s459_s9  ;;  %s541_s21 = scalar_lea.vmem %s767_s10, 256 }
  0x23   : > { %452 = vmatpush1.msk.msra.mxu0 %vm217_vm0, %v207_v1  ;;  %463 = vmatpush1.msk.msra.mxu1 %vm217_vm0, %v207_v1  ;;  %v323_v10 = vunpack.c.0.s8 %v322_v8  ;;  %p542_p1 = scmp.ne.s32.totalorder %s767_s10, %s541_s21  ;;  %s638_s24 = smov [#allocation3]  }
  0x24   : > { %453 = vmatmul.mubr.msk.f32.vlgmr.msra.gmra.mxu0 %vm210_vm1, %v205_v5  ;;  %454 = vmatmul.mubr.msk.f32.vlgmr.msra.gmra.mxu1 %vm210_vm1, %v206_v6  ;;  %s545_s28 = sshll.u32 %s638_s24, 4  ;;  %s546_s28 = int_to_ptr.vmem [resolvable:$false] %s545_s28 }
  0x25   : > { %v300_v2 = vld [vmem:[#allocation2] sm:$0x1]  ;;  %v326_v17 = vsub.s32 %v323_v10, %v325_v11  ;;  %p543_p2 = pnand %p542_p1, %p712_p3  ;;  %s547_s29 = scalar_lea.vmem %s546_s28, 512 }
  0x26   : > { %301 = vst [vmem:[#allocation2] sm:$0x1] %v636_v4  ;;  %p548_p5 = scmp.lt.s32.totalorder %s767_s10, %s546_s28  ;;  %p549_p6 = scmp.lt.s32.totalorder %s547_s29, %s541_s21 }
  0x27   : > { %p544_p4 = pneg %p543_p2 }
  0x28   : > { %p550_p7 = por %p549_p6, %p548_p5 }
  0x2a   : > { %p551_p9 = pnand %p550_p7, %p544_p4 }
  0x2d   : > { %v318_v22 = vld [vmem:[#allocation2] sm:$0x1] }
  0xe4   : > { %v288_v13 = vpop.f32.mrf.mxu0  ;;  %v294_v14 = vpop.f32.mrf.mxu1 }
  0xe5   : > { %v308_v15 = vadd.f32 %v455_v12, %v288_v13  ;;  %v309_v16 = vadd.f32 %v455_v12, %v294_v14 }
  0xe6   : > { %v296_v18 = vpop.f32.mrf.mxu1  ;;  %v290_v25 = vpop.f32.mrf.mxu0 }
  0xe7   : > { %310 = vst [vmem:[%s745_s27] sm:$0xff] %v308_v15  ;;  %311 = vst [vmem:[%s745_s27 + $0x8] sm:$0xff] %v309_v16  ;;  %v320_v19 = vcombine.high %v296_v18, %v296_v18 }
  0xe9   : > { %v327_v20 = vrot.slane %v320_v19, %v326_v17 }
  0xeb   : > { %v328_v21 = vcombine.high %v327_v20, %v327_v20 }
  0xed   : > { %v335_v23 = vrot.slane %v328_v21, %v326_v17 }
  0xee   : > { %v340_v24 = vld [vmem:[%s745_s27] sm:$0x1]  ;;  %v312_v26 = vld [vmem:[%s745_s27 + $0x1] sm:$0xff]  ;;  %v313_v27 = vld [vmem:[%s745_s27 + $0x9] sm:$0x7f] }
  0xef   : > { %v341_v28 = vadd.f32 %v340_v24, %v300_v2  ;;  %v314_v29 = vadd.f32 %v312_v26, %v290_v25  ;;  %v315_v30 = vadd.f32 %v313_v27, %v296_v18  ;;  %v336_v31 = vcombine.high %v335_v23, %v335_v23 }
  0xf1   : > { %342 = vst [vmem:[%s745_s27] sm:$0x1] %v341_v28  ;;  %316 = vst [vmem:[%s745_s27 + $0x1] sm:$0xff] %v314_v29  ;;  %v338_v32 = vadd.f32 %v336_v31, %v318_v22 }
  0xf2   : > { %317 = vst [vmem:[%s745_s27 + $0x9] sm:$0x7f] %v315_v30 }
  0xf3   : > { %554 = shalt.err (!%p551_p9)
}
  0xf4   : > { %s555_s4 = scalar_lea.hbm %s765_s20, 256  ;;  %s559_s6 = scalar_lea.hbm %s828_s3, 1024 }
  0xf5   : > { %p556_p10 = scmp.ne.s32.totalorder %s765_s20, %s555_s4  ;;  %p560_p13 = scmp.lt.s32.totalorder %s765_s20, %s828_s3 }
  0xf6   : > { %p561_p0 = scmp.lt.s32.totalorder %s559_s6, %s555_s4 }
  0xf7   : > { %p557_p11 = pnand %p556_p10, %p712_p3 }
  0xf8   : > { %p562_p1 = por %p561_p0, %p560_p13 }
  0xf9   : > { %p558_p12 = pneg %p557_p11 }
  0xfb   : > { %p563_p2 = pnand %p562_p1, %p558_p12 }
  0xfd   : > { %566 = shalt.err (!%p563_p2)
}
  0xfe   : > { %s639_s9 = smov 128   ;;  %s640_s16 = smov 8   ;;  %339 = vst [vmem:[#allocation2] sm:$0x1] %v338_v32 }
  0xff   : > { %464 = dma.vmem_to_hbm [thread:$0]  (%p712_p3), %s767_s10, 256, %s765_s20, %s774_s5, %s639_s9, %s639_s9, %s640_s16  }
 0x100 PF: > { %p470_p4 = scmp.ge.s32.totalorder %s633_s19, 2  ;;  %s374_s11 = sand.u32 1, %s605_s12  }
 0x101   : > { %s375_s21 = scalar_lea.sflag [#allocation4], %s374_s11 }
 0x102   : > { %p467_p5 = pnand %p470_p4, %p721_p8 }
 0x104   : > { %p468_p6 = pneg %p467_p5 }
 0x106   : > { %600 = dma.done.wait (%p468_p6), %s375_s21, 256  }
 0x107   : > { %602 = vsyncadd (%p468_p6), %s375_s21, 4294967040  ;;  %s16_s19 = sadd.s32 1, %s633_s19   ;;  %s831_s12 = smov %s609_s13 }
 0x108   : > { %p13_p7 = scmp.ge.s32.totalorder %s16_s19, 6   ;;  %s832_s13 = smov %s613_s14 }
 0x109   : > { %s833_s14 = smov %s730_s30  ;;  %s834_s15 = smov %s625_s17 }
 0x10a   : > { %s835_s16 = smov %s629_s18  ;;  %s836_s17 = smov %s839_s22 }
 0x10b   : > { %s837_s18 = smov %s843_s23  ;;  %15 = sbr.rel (!%p13_p7) target bundleno = 5 (0x5), region = 71 }
 0x110   :  { %380 = vsyncpa [#allocation4], 1 }
 0x111   :  { %382 = vsyncpa [#allocation4 + $0x1], 1 }

</bundles_post_ra>
